<compile_context>
chip_gen: v7x
topology: tpu7x:2x2x1
jax: 0.10.0
libtpu: 0.0.40
codegen_flags: <defaults>
</compile_context>

<pallas_src>
import jax
import jax.numpy as jnp
import numpy as np
from jax import lax
from jax.experimental import pallas as pl
from jax.experimental.pallas import tpu as pltpu

FIELD = 39
N_DENSE = 13
N_SPARSE = 26
EMB = 4                      # embedding_size
HIDDEN = [32, 32]            # hidden_dims
VOCAB = 50                   # feature_sizes[13:] (feature_sizes[:13] must be 1 for the conv)
BN_EPS = 1e-5


# --------------------------------------------------------------------------- #
# Kernel: per-row hot path (FM second order + deep layer-1 pre-BN).            #
# --------------------------------------------------------------------------- #
def deepfm_fused_kernel(flat_ref, wc_ref, b1_ref, out_ref):
    """flat_ref: (TB,156) bf16  -- deep_emb = [conv2 flat | emb2 * scrambled Xv]
       wc_ref:   (156,36) f32   -- [per-coordinate field-sum matrix | W1]
       b1_ref:   (1,32)   f32
       out_ref:  (TB,33)  f32   -- [:, :32] = h1 (pre-BN), [:, 32] = FM 2nd-order scalar
    """
    f32 = jnp.float32
    flat = flat_ref[...].astype(f32)                                   # (TB,156)

    # Merged MXU pass: columns [:4] = per-embedding-coordinate field sums,
    # columns [4:] = first deep layer (Linear 156->32).
    # NOTE: f32 matmul (multi-pass on the bf16 MXU) kept on purpose: compute is far
    # from the bottleneck and it avoids rounding W1 to bf16 (perf-review opt #9 skipped).
    y = jnp.dot(flat, wc_ref[...], preferred_element_type=f32)         # (TB,36)
    sum_vec = y[:, :EMB]                                               # (TB,4)
    h1 = y[:, EMB:] + b1_ref[...]                                      # (TB,32) pre-BN

    # FM second order: 0.5 * (|sum_vec|^2 - total sum of squares); the per-coordinate
    # sum of squares summed over coordinates collapses to the row-sum of flat^2.
    total_sq = jnp.sum(flat * flat, axis=1, keepdims=True)             # (TB,1)
    second = 0.5 * (jnp.sum(sum_vec * sum_vec, axis=1, keepdims=True) - total_sq)

    out_ref[...] = jnp.concatenate([h1, second], axis=1)               # (TB,33)


# --------------------------------------------------------------------------- #
# Wrapper glue                                                                 #
# --------------------------------------------------------------------------- #
def _batch_tile(batch, cap):
    """Largest divisor of `batch` <= cap, preferring multiples of 16 (bf16 sublane
    packing), then 8; falls back to the whole batch (full-dim block is allowed).
    TODO(synk): pad + mask rows for batch sizes with no aligned divisor so VMEM
    budgets hold for arbitrary production batch sizes."""
    cap = max(1, min(cap, batch))
    for align in (16, 8):
        start = cap - cap % align
        for t in range(start, 0, -align):
            if batch % t == 0:
                return t
    return batch


def _precompute_rows(params, Xi, Xv):
    """Conv/embedding/scramble glue (full batch, faithful to the reference's raw
    transpose/reshape batch mixing).  Returns:
      flat  (B,156) bf16 : deep_emb = [conv2 output | emb2 * scrambled Xv]
      first (B,)    f32  : FM first-order scalar (sum over all 39 fields)
    Everything here fuses into the gather/conv producers in XLA."""
    B = Xi.shape[0]
    xi_dense = Xi[:, :N_DENSE, 0].astype(jnp.float32)           # (B,13)
    xi_sparse = Xi[:, N_DENSE:, 0].astype(jnp.int32)            # (B,26)
    xv = Xv.astype(jnp.float32)                                 # (B,39)

    # grouped 1x1 conv over a length-1 sequence == per-field affine
    l1 = params["conv1_w"][None] * xi_dense[:, :, None] + params["conv1_b"][None]  # (B,13,E)
    l2 = params["conv2_w"][None] * xi_dense[:, :, None] + params["conv2_b"][None]
    l1_flat = l1.reshape(B, N_DENSE * EMB)
    l2_flat = l2.reshape(B, N_DENSE * EMB)

    # reference's transpose(0,1).reshape(...).view(...) scramble of the conv1 output
    lin1_scr = jnp.transpose(l1_flat).reshape(B, N_DENSE * EMB)

    # table-batched embedding bags with one index per bag == plain gather
    t_idx = jnp.arange(N_SPARSE)[None, :]
    emb1 = params["tables1"][t_idx, xi_sparse]                  # (B,26,E)
    emb2 = params["tables2"][t_idx, xi_sparse]

    # reference's `.view(S, E, B) * Xv[:,13:].reshape(S,1,B)` raw-reshape scramble
    xv_s = xv[:, N_DENSE:].reshape(N_SPARSE, 1, B)
    xvs_flat = jnp.broadcast_to(xv_s, (N_SPARSE, EMB, B)).reshape(B, N_SPARSE * EMB)
    emb1_flat = emb1.reshape(N_SPARSE, EMB, B).reshape(B, N_SPARSE * EMB)
    emb2_flat = emb2.reshape(N_SPARSE, EMB, B).reshape(B, N_SPARSE * EMB)

    # FM first-order scalar per row (never enters the kernel; added in the XLA tail).
    first = (jnp.sum(lin1_scr * jnp.repeat(xv[:, :N_DENSE], EMB, axis=1), axis=1)
             + jnp.sum(emb1_flat * xvs_flat, axis=1))                             # (B,)

    # Second-order / deep input (the reference's deep_emb), bf16 for HBM bandwidth.
    p = emb2_flat * xvs_flat                                                      # (B,104)
    flat = jnp.concatenate([l2_flat, p], axis=1).astype(jnp.bfloat16)             # (B,156)

    return {"flat": flat, "first": first}


def deepfm_forward(params, Xi, Xv, bias, *, tile_rows=4096):
    B = Xi.shape[0]
    f32 = jnp.float32
    rows = _precompute_rows(params, Xi, Xv)
    flat_b = rows["flat"]            # (B,156) bf16
    first = rows["first"]            # (B,)    f32

    # Merged weights: [per-coordinate field-sum | first deep layer] -> (156, 36).
    s39 = jnp.tile(jnp.eye(EMB, dtype=f32), (FIELD, 1))
    wc = jnp.concatenate([s39, params["w1"]], axis=1)

    # Batch tile: large tiles amortize the ~0.35 us/step pipeline overhead; keep at
    # least two grid steps so "parallel" can shard across both TensorCores on v7x.
    cap = min(tile_rows, B)
    if B >= 32:
        cap = min(cap, B // 2)
    TB = _batch_tile(B, cap)
    grid = (B // TB,)

    D_IN = FIELD * EMB               # 156
    D_OUT = HIDDEN[0] + 1            # 33 = [h1 | fm_second]

    packed = pl.pallas_call(
        deepfm_fused_kernel,
        grid=grid,
        in_specs=[pl.BlockSpec((TB, D_IN), lambda i: (i, 0)),
                  pl.BlockSpec((D_IN, EMB + HIDDEN[0]), lambda i: (0, 0)),
                  pl.BlockSpec((1, HIDDEN[0]), lambda i: (0, 0))],
        out_specs=pl.BlockSpec((TB, D_OUT), lambda i: (i, 0)),
        out_shape=jax.ShapeDtypeStruct((B, D_OUT), f32),
        compiler_params=pltpu.CompilerParams(
            dimension_semantics=("parallel",),
            # ~48 MiB is safe within v7x's 64 MiB/TC and ample for TB=4096; raise
            # toward 96 MiB on v5e/v6e (128 MiB VMEM) if tile_rows is pushed higher.
            vmem_limit_bytes=48 * 1024 * 1024),
    )(flat_b, wc, params["b1"])

    h1 = packed[:, :HIDDEN[0]]       # (B,32) pre-BN
    second = packed[:, HIDDEN[0]]    # (B,)   FM second order

    # ---- exact full-batch BatchNorm statistics + affine fold (tiny O(32^2) math) ----
    # The deep tail has no activation, so BN1 -> Linear2 -> BN2 -> column-sum is
    # affine in h1: deep_sum_row = h1_row . w_eff + c_eff, with BN2's batch stats
    # derived exactly from the covariance of h1 pushed through the affine maps.
    # TODO(synk): dropout_1 / dropout_2 are stochastic in train mode; identity here.
    # TODO(synk): BatchNorm running statistics are not updated (single forward only).
    # TODO(synk): kernel could also emit per-tile [sum(h1), h1^T h1] partials (indexed
    # per tile, not a revisited accumulator) to avoid this extra full-batch read of h1.
    g1, be1 = params["g1"][0], params["be1"][0]
    w2, b2 = params["w2"], params["b2"][0]
    g2, be2 = params["g2"][0], params["be2"][0]

    m1 = jnp.mean(h1, axis=0)                                    # (32,)
    hc = h1 - m1
    var1 = jnp.mean(hc * hc, axis=0)                             # biased (torch BN fwd)
    d1 = g1 * lax.rsqrt(var1 + BN_EPS)                           # BN1 scale
    cov1 = jnp.dot(hc.T, hc) / B                                 # (32,32) biased cov of h1
    cov_n = cov1 * d1[:, None] * d1[None, :]                     # cov of BN1 output
    mean2 = jnp.dot(be1, w2) + b2                                # mean of h2 (mean(BN1)=beta1)
    var2 = jnp.sum(w2 * jnp.dot(cov_n, w2), axis=0)              # diag(W2^T cov_n W2)
    d2 = g2 * lax.rsqrt(var2 + BN_EPS)                           # BN2 scale
    u = jnp.dot(w2, d2)                                          # (32,)
    w_eff = d1 * u                                               # (32,)
    c_eff = (jnp.dot(be1 - m1 * d1, u) + jnp.dot(b2, d2)
             + jnp.sum(be2 - mean2 * d2))

    total = second + first + jnp.dot(h1, w_eff) + c_eff + bias.astype(f32)
    return total


# --------------------------------------------------------------------------- #
# Pure-JAX reference (straightforward math, full-batch BN), for validation.    #
# --------------------------------------------------------------------------- #
def deepfm_reference(params, Xi, Xv, bias):
    rows = _precompute_rows(params, Xi, Xv)
    flat = rows["flat"].astype(jnp.float32)     # mirror kernel's bf16-rounded rows
    first = rows["first"]
    s39 = jnp.tile(jnp.eye(EMB, dtype=jnp.float32), (FIELD, 1))
    sum_vec = flat @ s39
    sum_sq = (flat * flat) @ s39
    fm_second = jnp.sum(0.5 * (sum_vec * sum_vec - sum_sq), axis=1)
    h1 = flat @ params["w1"] + params["b1"]
    h1n = (h1 - h1.mean(0)) * lax.rsqrt(h1.var(0) + BN_EPS) * params["g1"] + params["be1"]
    h2 = h1n @ params["w2"] + params["b2"]
    h2n = (h2 - h2.mean(0)) * lax.rsqrt(h2.var(0) + BN_EPS) * params["g2"] + params["be2"]
    return first + fm_second + jnp.sum(h2n, axis=1) + bias.astype(jnp.float32)


def init_params(key):
    ks = jax.random.split(key, 10)
    p = {}
    # Conv1d(13 -> 52, k=1, groups=13): per-field affine, stored as (13, E).
    p["conv1_w"] = 0.1 * jax.random.normal(ks[0], (N_DENSE, EMB), jnp.float32)
    p["conv1_b"] = 0.1 * jax.random.normal(ks[1], (N_DENSE, EMB), jnp.float32)
    p["conv2_w"] = 0.1 * jax.random.normal(ks[2], (N_DENSE, EMB), jnp.float32)
    p["conv2_b"] = 0.1 * jax.random.normal(ks[3], (N_DENSE, EMB), jnp.float32)
    # 26 embedding tables each (VOCAB, EMB) for the first- and second-order parts.
    p["tables1"] = 0.1 * jax.random.normal(ks[4], (N_SPARSE, VOCAB, EMB), jnp.float32)
    p["tables2"] = 0.1 * jax.random.normal(ks[5], (N_SPARSE, VOCAB, EMB), jnp.float32)
    d0 = FIELD * EMB                                  # 156
    p["w1"] = 0.05 * jax.random.normal(ks[6], (d0, HIDDEN[0]), jnp.float32)
    p["b1"] = 0.05 * jax.random.normal(ks[7], (1, HIDDEN[0]), jnp.float32)
    p["g1"] = jnp.ones((1, HIDDEN[0]), jnp.float32)
    p["be1"] = jnp.zeros((1, HIDDEN[0]), jnp.float32)
    p["w2"] = 0.05 * jax.random.normal(ks[8], (HIDDEN[0], HIDDEN[1]), jnp.float32)
    p["b2"] = 0.05 * jax.random.normal(ks[9], (1, HIDDEN[1]), jnp.float32)
    p["g2"] = jnp.ones((1, HIDDEN[1]), jnp.float32)
    p["be2"] = jnp.zeros((1, HIDDEN[1]), jnp.float32)
    # NOTE: the reference only instantiates linear_1/linear_2 (len(hidden_dims)),
    # so the num_classes projection is never applied in its forward.
    return p


if __name__ == "__main__":
    key = jax.random.PRNGKey(0)
    k_dense, k_sparse, k_xv, k_bias, k_param = jax.random.split(key, 5)

    B = 64
    xi_dense_in = jax.random.normal(k_dense, (B, N_DENSE, 1), jnp.float32)
    xi_sparse_in = jax.random.randint(
        k_sparse, (B, N_SPARSE, 1), 0, VOCAB).astype(jnp.float32)
    Xi = jnp.concatenate([xi_dense_in, xi_sparse_in], axis=1)            # (B,39,1)
    Xv = jax.random.uniform(k_xv, (B, FIELD), jnp.float32)               # (B,39)
    # Reference creates torch.randn(B) each forward; taken as a deterministic input here.
    bias = jax.random.normal(k_bias, (B,), jnp.float32)

    params = init_params(k_param)

    # f32-accurate XLA dots so the fold / reference / kernel agree tightly.
    with jax.default_matmul_precision("highest"):
        fwd = jax.jit(deepfm_forward, static_argnames=("tile_rows",))
        total = jax.block_until_ready(fwd(params, Xi, Xv, bias))         # TB=32, grid=(2,)
        assert total.shape == (B,)
        ref = jax.block_until_ready(jax.jit(deepfm_reference)(params, Xi, Xv, bias))

    np.testing.assert_allclose(np.asarray(total), np.asarray(ref), rtol=2e-3, atol=2e-3)
    print("KERNEL_OK")
</pallas_src>

<mosaic_0001>
module attributes {stable_mosaic.version = 11 : i64} {
  func.func private @main(%arg0: i32) attributes {dimension_semantics = [#tpu.dimension_semantics<core_parallel>], iteration_bounds = array<i64: 2>, tpu.core_type = #tpu.core_type<sc_scalar_subcore>, window_params = []} {
    return
  }
}

module attributes {stable_mosaic.version = 11 : i64} {
  func.func private @main(%arg0: i32) attributes {dimension_semantics = [#tpu.dimension_semantics<core_parallel>], iteration_bounds = array<i64: 2>, tpu.core_type = #tpu.core_type<sc_scalar_subcore>, window_params = []} {
    return
  }
}

module attributes {stable_mosaic.version = 11 : i64} {
  func.func @deepfm_fused_kernel(%arg0: i32, %arg1: memref<32x156xbf16, #tpu.memory_space<vmem>>, %arg2: memref<156x36xf32, #tpu.memory_space<vmem>>, %arg3: memref<1x32xf32, #tpu.memory_space<vmem>>, %arg4: memref<32x33xf32, #tpu.memory_space<vmem>>) attributes {dimension_semantics = [#tpu.dimension_semantics<parallel>], iteration_bounds = array<i64: 2>, scalar_prefetch = 0 : i64, scratch_operands = 0 : i64, tpu.core_type = #tpu.core_type<tc>, window_params = [{transform_indices = @transform_0, window_bounds = array<i64: 32, 156>}, {pipeline_mode = #tpu.pipeline_mode<synchronous>, transform_indices = @transform_1, window_bounds = array<i64: 156, 36>}, {pipeline_mode = #tpu.pipeline_mode<synchronous>, transform_indices = @transform_2, window_bounds = array<i64: 1, 32>}, {transform_indices = @transform_3, window_bounds = array<i64: 32, 33>}]} {
    %c0 = arith.constant 0 : index
    %c0_0 = arith.constant 0 : index
    %0 = vector.load %arg1[%c0, %c0_0] : memref<32x156xbf16, #tpu.memory_space<vmem>>, vector<32x156xbf16>
    %1 = arith.extf %0 : vector<32x156xbf16> to vector<32x156xf32>
    %c0_1 = arith.constant 0 : index
    %c0_2 = arith.constant 0 : index
    %2 = vector.load %arg2[%c0_1, %c0_2] : memref<156x36xf32, #tpu.memory_space<vmem>>, vector<156x36xf32>
    %cst = arith.constant dense<0.000000e+00> : vector<32x36xf32>
    %3 = tpu.matmul %1, %2, %cst {dimension_numbers = #tpu.dot_dimension_numbers<[1], [0], [0], [1], [0, 0, 1, 1], [], []>, precision = #tpu.contract_precision<fp32>} : vector<32x156xf32>, vector<156x36xf32>, vector<32x36xf32> -> vector<32x36xf32>
    %4 = vector.extract_strided_slice %3 {offsets = [0, 0], sizes = [32, 4], strides = [1, 1]} : vector<32x36xf32> to vector<32x4xf32>
    %5 = vector.extract_strided_slice %3 {offsets = [0, 4], sizes = [32, 32], strides = [1, 1]} : vector<32x36xf32> to vector<32x32xf32>
    %c0_3 = arith.constant 0 : index
    %c0_4 = arith.constant 0 : index
    %6 = vector.load %arg3[%c0_3, %c0_4] : memref<1x32xf32, #tpu.memory_space<vmem>>, vector<1x32xf32>
    %7 = vector.broadcast %6 : vector<1x32xf32> to vector<32x32xf32>
    %8 = arith.addf %5, %7 : vector<32x32xf32>
    %9 = arith.mulf %1, %1 : vector<32x156xf32>
    %cst_5 = arith.constant dense<0.000000e+00> : vector<32xf32>
    %10 = vector.multi_reduction <add>, %9, %cst_5 [1] : vector<32x156xf32> to vector<32xf32>
    %11 = vector.shape_cast %10 : vector<32xf32> to vector<32x1xf32>
    %12 = arith.mulf %4, %4 : vector<32x4xf32>
    %cst_6 = arith.constant dense<0.000000e+00> : vector<32xf32>
    %13 = vector.multi_reduction <add>, %12, %cst_6 [1] : vector<32x4xf32> to vector<32xf32>
    %14 = vector.shape_cast %13 : vector<32xf32> to vector<32x1xf32>
    %15 = arith.subf %14, %11 : vector<32x1xf32>
    %cst_7 = arith.constant 5.000000e-01 : f32
    %16 = vector.broadcast %cst_7 : f32 to vector<32x1xf32>
    %17 = arith.mulf %16, %15 : vector<32x1xf32>
    %18 = tpu.concatenate %8, %17 in 1 : vector<32x32xf32>, vector<32x1xf32> -> vector<32x33xf32>
    %c0_8 = arith.constant 0 : index
    %c0_9 = arith.constant 0 : index
    %19 = vector.load %arg4[%c0_8, %c0_9] : memref<32x33xf32, #tpu.memory_space<vmem>>, vector<32x33xf32>
    tpu.vector_store %arg4[%c0_8, %c0_9], %18 {strides = array<i32>} : memref<32x33xf32, #tpu.memory_space<vmem>>, vector<32x33xf32>,
    return
  }
  func.func @transform_0(%arg0: i32) -> (i32, i32) {
    %c0_i32 = arith.constant 0 : i32
    %c0_i32_0 = arith.constant 0 : i32
    return %arg0, %c0_i32 : i32, i32
  }
  func.func @transform_1(%arg0: i32) -> (i32, i32) {
    %c0_i32 = arith.constant 0 : i32
    %c0_i32_0 = arith.constant 0 : i32
    %c0_i32_1 = arith.constant 0 : i32
    return %c0_i32, %c0_i32_0 : i32, i32
  }
  func.func @transform_2(%arg0: i32) -> (i32, i32) {
    %c0_i32 = arith.constant 0 : i32
    %c0_i32_0 = arith.constant 0 : i32
    %c0_i32_1 = arith.constant 0 : i32
    return %c0_i32, %c0_i32_0 : i32, i32
  }
  func.func @transform_3(%arg0: i32) -> (i32, i32) {
    %c0_i32 = arith.constant 0 : i32
    %c0_i32_0 = arith.constant 0 : i32
    return %arg0, %c0_i32 : i32, i32
  }
}

</mosaic_0001>

<bundles_post_ra>
// kernel: tile.9
= control target key start
LH: loop header
LB: loop body
LE: loop exit
PB: predicated region body
PF: predicated region fallthrough
CT: control target
= control target key end

     0   :  { %s345_s8 = smov 124   ;;  %s346_s11 = smov 116   ;;  %vm5_vm0 = vcmask 1041409   ;;  %vm7_vm1 = vcmask 31744   ;;  %vm190_vm2 = vcmask 1047556   ;;  %vm40_vm3 = vcmask 1048544   ;;  %s541_s0 = inlined_call_operand.vmem [shape: f32[39,4,4], index: 0, kind: input, shape index: {}]   ;;  %s542_s1 = inlined_call_operand.vmem [shape: f32[156,4], index: 1, kind: output, shape index: {}]  }
   0x1   :  { %v276_v0 = vld [vmem:[%s541_s0 + $0x1f] ss:$40 sm:$0xf]   ;;  %v278_v1 = vld [vmem:[%s541_s0 + $0x1d] ss:$40 sm:$0xf]  }
   0x2   :  { %38 = vrot.lane.b32.xlu0 %v276_v0, %s345_s8  ;;  %50 = vrot.lane.b32.xlu1 %v278_v1, %s346_s11  ;;  %v277_v2 = vld [vmem:[%s541_s0 + $0x1e] ss:$40 sm:$0xf]   ;;  %v279_v3 = vld [vmem:[%s541_s0 + $0x1c] ss:$40 sm:$0xf]  }
   0x3   :  { %s347_s16 = smov 120   ;;  %s348_s17 = smov 112   ;;  %v280_v4 = vld [vmem:[%s541_s0 + $0x1b] ss:$40 sm:$0xf]   ;;  %vm46_vm4 = vcmask 1015744  }
   0x4   :  { %v281_v5 = vld [vmem:[%s541_s0 + $0x1a] ss:$40 sm:$0xf]   ;;  %s349_s22 = smov 108   ;;  %s350_s23 = smov 104   ;;  %vm52_vm5 = vcmask 982944  }
   0x5   :  { %v282_v6 = vld [vmem:[%s541_s0 + $0x19] ss:$40 sm:$0xf]   ;;  %v283_v7 = vld [vmem:[%s541_s0 + $0x18] ss:$40 sm:$0xf]  }
   0x6   :  { %44 = vrot.lane.b32.xlu0 %v277_v2, %s347_s16  ;;  %56 = vrot.lane.b32.xlu1 %v279_v3, %s348_s17  ;;  %s351_s28 = smov 100   ;;  %s352_s29 = smov 96   ;;  %v284_v8 = vld [vmem:[%s541_s0 + $0x17] ss:$40 sm:$0xf]   ;;  %vm58_vm6 = vcmask 950144  }
   0x7   :  { %v285_v9 = vld [vmem:[%s541_s0 + $0x16] ss:$40 sm:$0xf]   ;;  %s353_s5 = smov 92   ;;  %s354_s6 = smov 88   ;;  %vm64_vm7 = vcmask 917344  }
   0x8   :  { %v286_v10 = vld [vmem:[%s541_s0 + $0x15] ss:$40 sm:$0xf]   ;;  %v287_v11 = vld [vmem:[%s541_s0 + $0x14] ss:$40 sm:$0xf]  }
   0x9   :  { %s355_s11 = smov 84   ;;  %s356_s12 = smov 80   ;;  %v288_v12 = vld [vmem:[%s541_s0 + $0x13] ss:$40 sm:$0xf]   ;;  %vm70_vm8 = vcmask 884544  }
   0xa   :  { %62 = vrot.lane.b32.xlu0 %v280_v4, %s349_s22  ;;  %68 = vrot.lane.b32.xlu1 %v281_v5, %s350_s23  ;;  %v289_v13 = vld [vmem:[%s541_s0 + $0x12] ss:$40 sm:$0xf]   ;;  %s357_s17 = smov 76   ;;  %s358_s22 = smov 72   ;;  %vm76_vm9 = vcmask 851744  }
   0xb   :  { %v290_v14 = vld [vmem:[%s541_s0 + $0x11] ss:$40 sm:$0xf]   ;;  %v291_v15 = vld [vmem:[%s541_s0 + $0x10] ss:$40 sm:$0xf]  }
   0xc   :  { %v2_v16 = vld [vmem:[%s541_s0] sm:$0x1]   ;;  %v270_v19 = vld [vmem:[%s541_s0 + $0x28] sm:$0x1]   ;;  %v272_v21 = vld [vmem:[%s541_s0 + $0x50] sm:$0x1]  }
   0xd   :  { %v269_v17 = vld [vmem:[%s541_s0 + $0x1f] sm:$0x2]   ;;  %v271_v20 = vld [vmem:[%s541_s0 + $0x47] sm:$0x2]   ;;  %v273_v23 = vld [vmem:[%s541_s0 + $0x6f] sm:$0x2]  }
   0xe   :  { %74 = vrot.lane.b32.xlu0 %v282_v6, %s351_s28  ;;  %80 = vrot.lane.b32.xlu1 %v283_v7, %s352_s29  ;;  %v6_v18 = vsel %vm5_vm0, %v269_v17, %v2_v16  ;;  %v14_v22 = vsel %vm5_vm0, %v271_v20, %v270_v19  ;;  %v274_v24 = vld [vmem:[%s541_s0 + $0x78] sm:$0x1]   ;;  %s359_s10 = smov 68   ;;  %v23_v26 = vsel %vm5_vm0, %v273_v23, %v272_v21  ;;  %v292_v28 = vld [vmem:[%s541_s0 + $0xf] ss:$40 sm:$0xf]  }
   0xf   :  { %8 = vst.msk [vmem:[#allocation0] ss:$8 sm:$0x3] %vm7_vm1, %v6_v18   ;;  %v275_v25 = vld [vmem:[%s541_s0 + $0x97] sm:$0x2]   ;;  %s361_s16 = smov 60  }
  0x10   :  { %17 = vst.msk [vmem:[#allocation0 + $0x1] ss:$8 sm:$0x3] %vm7_vm1, %v14_v22   ;;  %v32_v27 = vsel %vm5_vm0, %v275_v25, %v274_v24  ;;  %26 = vst.msk [vmem:[#allocation0 + $0x2] ss:$8 sm:$0x3] %vm7_vm1, %v23_v26  }
  0x11   :  { %35 = vst.msk [vmem:[#allocation0 + $0x3] ss:$8 sm:$0x3] %vm7_vm1, %v32_v27   ;;  %v293_v29 = vld [vmem:[%s541_s0 + $0xe] ss:$40 sm:$0xf]  }
  0x12   :  { %86 = vrot.lane.b32.xlu0 %v284_v8, %s353_s5  ;;  %92 = vrot.lane.b32.xlu1 %v285_v9, %s354_s6  ;;  %v294_v30 = vld [vmem:[%s541_s0 + $0xd] ss:$40 sm:$0xf]   ;;  %v295_v31 = vld [vmem:[%s541_s0 + $0xc] ss:$40 sm:$0xf]  }
  0x13   :  { %s364_s23 = smov 48   ;;  %v296_v32 = vld [vmem:[%s541_s0 + $0xb] ss:$40 sm:$0xf]   ;;  %s365_s28 = smov 44   ;;  %vm82_vm10 = vcmask 818944  }
  0x14   :  { %v297_v33 = vld [vmem:[%s541_s0 + $0xa] ss:$40 sm:$0xf]   ;;  %s366_s29 = smov 40   ;;  %s367_s9 = smov 36   ;;  %vm88_vm11 = vcmask 786144  }
  0x15   :  { %v298_v34 = vld [vmem:[%s541_s0 + $0x9] ss:$40 sm:$0xf]   ;;  %v299_v35 = vld [vmem:[%s541_s0 + $0x8] ss:$40 sm:$0xf]  }
  0x16   :  { %98 = vrot.lane.b32.xlu0 %v286_v10, %s355_s11  ;;  %104 = vrot.lane.b32.xlu1 %v287_v11, %s356_s12  ;;  %s360_s11 = smov 64   ;;  %v301_v36 = vld [vmem:[%s541_s0 + $0x6] ss:$40 sm:$0xf]   ;;  %s369_s21 = smov 28   ;;  %vm94_vm12 = vcmask 753344  }
  0x17   :  { %v302_v37 = vld [vmem:[%s541_s0 - $0x7a] ss:$40 sm:$0xf0]   ;;  %v300_v38 = vld [vmem:[%s541_s0 + $0x7] ss:$40 sm:$0xf]  }
  0x18   :  { %v191_v39 = vsel %vm190_vm2, %v302_v37, %v301_v36  ;;  %v303_v40 = vld [vmem:[%s541_s0 + $0x5] ss:$40 sm:$0xf]   ;;  %v305_v42 = vld [vmem:[%s541_s0 + $0x4] ss:$40 sm:$0xf]  }
  0x19   :  { %v304_v41 = vld [vmem:[%s541_s0 - $0x7b] ss:$40 sm:$0xf0]   ;;  %v306_v43 = vld [vmem:[%s541_s0 - $0x7c] ss:$40 sm:$0xf0]  }
  0x1a   :  { %110 = vrot.lane.b32.xlu0 %v288_v12, %s357_s17  ;;  %116 = vrot.lane.b32.xlu1 %v289_v13, %s358_s22  ;;  %s362_s17 = smov 56   ;;  %s363_s22 = smov 52   ;;  %v203_v44 = vsel %vm190_vm2, %v304_v41, %v303_v40  ;;  %v215_v45 = vsel %vm190_vm2, %v306_v43, %v305_v42  ;;  %v307_v46 = vld [vmem:[%s541_s0 + $0x3] ss:$40 sm:$0xf]   ;;  %vm100_vm13 = vcmask 720544  }
  0x1b   :  { %v308_v47 = vld [vmem:[%s541_s0 - $0x7d] ss:$40 sm:$0xf0]   ;;  %v309_v48 = vld [vmem:[%s541_s0 + $0x2] ss:$40 sm:$0xf]  }
  0x1c   :  { %v310_v49 = vld [vmem:[%s541_s0 - $0x7e] ss:$40 sm:$0xf0]   ;;  %s371_s2 = smov 20   ;;  %s372_s3 = smov 16   ;;  %v227_v50 = vsel %vm190_vm2, %v308_v47, %v307_v46  ;;  %vm106_vm14 = vcmask 687744  }
  0x1d   :  { %v239_v51 = vsel %vm190_vm2, %v310_v49, %v309_v48  ;;  %v311_v52 = vld [vmem:[%s541_s0 + $0x1] ss:$40 sm:$0xf]   ;;  %s374_s8 = smov 8   ;;  %vm112_vm15 = vcmask 654944   ;;  %vm118_vm0 = vcmask 622144  }
  0x1e   :  { %122 = vrot.lane.b32.xlu0 %v290_v14, %s359_s10  ;;  %128 = vrot.lane.b32.xlu1 %v291_v15, %s360_s11  ;;  %s368_s10 = smov 32   ;;  %v312_v53 = vld [vmem:[%s541_s0 - $0x7f] ss:$40 sm:$0xf0]   ;;  %s373_s0 = smov 12   ;;  %vm124_vm1 = vcmask 589344  }
  0x1f   :  { %v251_v54 = vsel %vm190_vm2, %v312_v53, %v311_v52  ;;  %vm130_vm2 = vcmask 556544  }
  0x22   :  { %134 = vrot.lane.b32.xlu0 %v292_v28, %s361_s16  ;;  %140 = vrot.lane.b32.xlu1 %v293_v29, %s362_s17 }
  0x26   :  { %146 = vrot.lane.b32.xlu0 %v294_v30, %s363_s22  ;;  %152 = vrot.lane.b32.xlu1 %v295_v31, %s364_s23  ;;  %s370_s22 = smov 24  }
  0x2a   :  { %158 = vrot.lane.b32.xlu0 %v296_v32, %s365_s28  ;;  %164 = vrot.lane.b32.xlu1 %v297_v33, %s366_s29 }
  0x2e   :  { %170 = vrot.lane.b32.xlu0 %v298_v34, %s367_s9  ;;  %176 = vrot.lane.b32.xlu1 %v299_v35, %s368_s10  ;;  %s375_s9 = smov 4  }
  0x32   :  { %182 = vrot.lane.b32.xlu0 %v300_v38, %s369_s21  ;;  %192 = vrot.lane.b32.xlu1 %v191_v39, %s370_s22 }
  0x36   :  { %204 = vrot.lane.b32.xlu0 %v203_v44, %s371_s2  ;;  %216 = vrot.lane.b32.xlu1 %v215_v45, %s372_s3 }
  0x3a   :  { %228 = vrot.lane.b32.xlu0 %v227_v50, %s373_s0  ;;  %240 = vrot.lane.b32.xlu1 %v239_v51, %s374_s8 }
  0x3e   :  { %252 = vrot.lane.b32.xlu0 %v251_v54, %s375_s9 }
  0x74   :  { %v39_v55 = vpop.permute.xlu0 %38   ;;  %v51_v56 = vpop.permute.xlu1 %50  }
  0x75   :  { %41 = vst.msk [vmem:[#allocation0] sm:$0xf] %vm40_vm3, %v39_v55   ;;  %vm136_vm3 = vcmask 523744  }
  0x78   :  { %v45_v57 = vpop.permute.xlu0 %44   ;;  %v57_v58 = vpop.permute.xlu1 %56  }
  0x79   :  { %47 = vst.msk [vmem:[#allocation0] sm:$0xf] %vm46_vm4, %v45_v57   ;;  %vm142_vm4 = vcmask 490944  }
  0x7a   :  { %53 = vst.msk [vmem:[#allocation0] sm:$0xf] %vm52_vm5, %v51_v56   ;;  %vm148_vm5 = vcmask 458144  }
  0x7b   :  { %59 = vst.msk [vmem:[#allocation0] sm:$0xf] %vm58_vm6, %v57_v58   ;;  %vm154_vm6 = vcmask 425344  }
  0x7c   :  { %v63_v59 = vpop.permute.xlu0 %62   ;;  %v69_v60 = vpop.permute.xlu1 %68  }
  0x7d   :  { %65 = vst.msk [vmem:[#allocation0] sm:$0xf] %vm64_vm7, %v63_v59   ;;  %vm160_vm7 = vcmask 392544  }
  0x7e   :  { %71 = vst.msk [vmem:[#allocation0] sm:$0xf] %vm70_vm8, %v69_v60   ;;  %vm166_vm8 = vcmask 359744  }
  0x80   :  { %v75_v61 = vpop.permute.xlu0 %74   ;;  %v81_v62 = vpop.permute.xlu1 %80  }
  0x81   :  { %77 = vst.msk [vmem:[#allocation0] sm:$0xf] %vm76_vm9, %v75_v61   ;;  %vm172_vm9 = vcmask 326944  }
  0x82   :  { %83 = vst.msk [vmem:[#allocation0] sm:$0xf] %vm82_vm10, %v81_v62   ;;  %vm178_vm10 = vcmask 294144  }
  0x84   :  { %v87_v63 = vpop.permute.xlu0 %86   ;;  %v93_v0 = vpop.permute.xlu1 %92  }
  0x85   :  { %89 = vst.msk [vmem:[#allocation0] sm:$0xf] %vm88_vm11, %v87_v63   ;;  %vm184_vm11 = vcmask 261344  }
  0x86   :  { %95 = vst.msk [vmem:[#allocation0] sm:$0xf] %vm94_vm12, %v93_v0   ;;  %vm194_vm12 = vcmask 228544  }
  0x88   :  { %v99_v1 = vpop.permute.xlu0 %98   ;;  %v105_v2 = vpop.permute.xlu1 %104  }
  0x89   :  { %101 = vst.msk [vmem:[#allocation0] sm:$0xf] %vm100_vm13, %v99_v1   ;;  %vm206_vm13 = vcmask 195744  }
  0x8a   :  { %107 = vst.msk [vmem:[#allocation0] sm:$0xf] %vm106_vm14, %v105_v2   ;;  %vm218_vm14 = vcmask 162944  }
  0x8c   :  { %v111_v3 = vpop.permute.xlu0 %110   ;;  %v117_v4 = vpop.permute.xlu1 %116  }
  0x8d   :  { %113 = vst.msk [vmem:[#allocation0] sm:$0xf] %vm112_vm15, %v111_v3   ;;  %vm230_vm15 = vcmask 130144  }
  0x8e   :  { %119 = vst.msk [vmem:[#allocation0] sm:$0xf] %vm118_vm0, %v117_v4   ;;  %vm242_vm0 = vcmask 97344  }
  0x90   :  { %v123_v5 = vpop.permute.xlu0 %122   ;;  %v129_v6 = vpop.permute.xlu1 %128  }
  0x91   :  { %125 = vst.msk [vmem:[#allocation0] sm:$0xf] %vm124_vm1, %v123_v5   ;;  %vm254_vm1 = vcmask 64544  }
  0x92   :  { %131 = vst.msk [vmem:[#allocation0] sm:$0xf] %vm130_vm2, %v129_v6  }
  0x94   :  { %v135_v7 = vpop.permute.xlu0 %134   ;;  %v141_v8 = vpop.permute.xlu1 %140  }
  0x95   :  { %137 = vst.msk [vmem:[#allocation0] sm:$0xf] %vm136_vm3, %v135_v7  }
  0x96   :  { %143 = vst.msk [vmem:[#allocation0] sm:$0xf] %vm142_vm4, %v141_v8  }
  0x98   :  { %v147_v9 = vpop.permute.xlu0 %146   ;;  %v153_v10 = vpop.permute.xlu1 %152  }
  0x99   :  { %149 = vst.msk [vmem:[#allocation0] sm:$0xf] %vm148_vm5, %v147_v9  }
  0x9a   :  { %155 = vst.msk [vmem:[#allocation0] sm:$0xf] %vm154_vm6, %v153_v10  }
  0x9c   :  { %v159_v11 = vpop.permute.xlu0 %158   ;;  %v165_v12 = vpop.permute.xlu1 %164  }
  0x9d   :  { %161 = vst.msk [vmem:[#allocation0] sm:$0xf] %vm160_vm7, %v159_v11  }
  0x9e   :  { %167 = vst.msk [vmem:[#allocation0] sm:$0xf] %vm166_vm8, %v165_v12  }
  0xa0   :  { %v171_v13 = vpop.permute.xlu0 %170   ;;  %v177_v14 = vpop.permute.xlu1 %176  }
  0xa1   :  { %173 = vst.msk [vmem:[#allocation0] sm:$0xf] %vm172_vm9, %v171_v13  }
  0xa2   :  { %179 = vst.msk [vmem:[#allocation0] sm:$0xf] %vm178_vm10, %v177_v14  }
  0xa4   :  { %v183_v15 = vpop.permute.xlu0 %182   ;;  %v193_v16 = vpop.permute.xlu1 %192  }
  0xa5   :  { %185 = vst.msk [vmem:[#allocation0] sm:$0xf] %vm184_vm11, %v183_v15  }
  0xa6   :  { %195 = vst.msk [vmem:[#allocation0] sm:$0xf] %vm194_vm12, %v193_v16   ;;  %197 = vst.msk [vmem:[#allocation0 + $0x4] sm:$0xf0] %vm194_vm12, %v193_v16  }
  0xa8   :  { %v205_v17 = vpop.permute.xlu0 %204   ;;  %v217_v18 = vpop.permute.xlu1 %216  }
  0xa9   :  { %207 = vst.msk [vmem:[#allocation0] sm:$0xf] %vm206_vm13, %v205_v17   ;;  %209 = vst.msk [vmem:[#allocation0 + $0x4] sm:$0xf0] %vm206_vm13, %v205_v17  }
  0xaa   :  { %219 = vst.msk [vmem:[#allocation0] sm:$0xf] %vm218_vm14, %v217_v18   ;;  %221 = vst.msk [vmem:[#allocation0 + $0x4] sm:$0xf0] %vm218_vm14, %v217_v18  }
  0xac   :  { %v229_v19 = vpop.permute.xlu0 %228   ;;  %v241_v20 = vpop.permute.xlu1 %240  }
  0xad   :  { %231 = vst.msk [vmem:[#allocation0] sm:$0xf] %vm230_vm15, %v229_v19   ;;  %233 = vst.msk [vmem:[#allocation0 + $0x4] sm:$0xf0] %vm230_vm15, %v229_v19  }
  0xae   :  { %243 = vst.msk [vmem:[#allocation0] sm:$0xf] %vm242_vm0, %v241_v20   ;;  %245 = vst.msk [vmem:[#allocation0 + $0x4] sm:$0xf0] %vm242_vm0, %v241_v20  }
  0xb0   :  { %v253_v21 = vpop.permute.xlu0 %252  }
  0xb1   :  { %255 = vst.msk [vmem:[#allocation0] sm:$0xf] %vm254_vm1, %v253_v21   ;;  %257 = vst.msk [vmem:[#allocation0 + $0x4] sm:$0xf0] %vm254_vm1, %v253_v21  }
  0xb8   :  { %v261_v22 = vld [vmem:[#allocation0] sm:$0xf]  ;;  %v265_v23 = vld [vmem:[#allocation0 + $0x8] sm:$0xf] }
  0xb9   :  { %263 = vst [vmem:[%s542_s1] sm:$0xf] %v261_v22  ;;  %313 = vst [vmem:[%s542_s1 + $0x4] sm:$0xf] %v265_v23 }

// kernel: deepfm_forward.1
= control target key start
LH: loop header
LB: loop body
LE: loop exit
PB: predicated region body
PF: predicated region fallthrough
CT: control target
= control target key end

     0   :  { %s1504_s12 = smov 0   ;;  %s2168_s0 = inlined_call_operand.vmem [shape: bf16[64,156], index: 0, kind: input, shape index: {}]   ;;  %s2169_s1 = inlined_call_operand.vmem [shape: f32[156,36], index: 1, kind: input, shape index: {}]   ;;  %s2170_s2 = inlined_call_operand.vmem [shape: f32[1,32], index: 2, kind: input, shape index: {}]   ;;  %s2171_s3 = inlined_call_operand.vmem [shape: f32[64,33], index: 3, kind: output, shape index: {}]  }
   0x1 LB: > { %s1220_s13 = sadd.s32 4294967295, %s1479_s12   ;;  %p1224_p0 = scmp.ge.s32.totalorder %s1479_s12, 1  ;;  %s1479_s12 = sphi %s1504_s12, %s13_s12  }
   0x2   : > { %p139_p1 = scmp.lt.s32.totalorder %s1479_s12, 3 }
   0x4   : > { %p140_p2 = pnand %p1224_p0, %p139_p1 }
   0x6   : > { %143 = sbr.rel (%p140_p2) target bundleno = 599 (0x257), region = 32 }
   0xd   : > { %v1515_v0 = vld [vmem:[%s2169_s1] sm:$0xff]  ;;  %v1520_v1 = vld [vmem:[%s2169_s1 + $0x8] sm:$0xff]  ;;  %v1525_v2 = vld [vmem:[%s2169_s1 + $0x10] sm:$0xff]  ;;  %s1225_s20 = sshll.u32 %s1220_s13, 2  ;;  %v2182_v3 = vmov 0.0|0.0   ;;  %s1482_s15 = smov 4  }
   0xe   : > { %1246 = vmatprep.subr.bf16.mxu1 %v2182_v3  ;;  %1336 = vmatprep.subr.bf16.mxu0 %v2182_v3  ;;  %v227_v4 = vand.u32 4294901760, %v1515_v0  ;;  %v230_v5 = vand.u32 4294901760, %v1520_v1  ;;  %v1534_v6 = vld [vmem:[%s2169_s1 + $0x18] sm:$0xff]  ;;  %v233_v7 = vand.u32 4294901760, %v1525_v2  ;;  %v1541_v9 = vld [vmem:[%s2169_s1 + $0x20] sm:$0xff]  ;;  %v1546_v10 = vld [vmem:[%s2169_s1 + $0x28] sm:$0xff] }
   0xf   : > { %v236_v8 = vand.u32 4294901760, %v1534_v6  ;;  %p165_p3 = scmp.lt.s32.totalorder %s1225_s20, 7  ;;  %v239_v13 = vand.u32 4294901760, %v1541_v9  ;;  %v242_v14 = vand.u32 4294901760, %v1546_v10  ;;  %v1567_v15 = vld [vmem:[%s2169_s1 + $0x30] sm:$0xff]  ;;  %v1572_v16 = vld [vmem:[%s2169_s1 + $0x38] sm:$0xff] }
  0x10   : > { %v1550_v11 = vpack.c.bf16 %v230_v5, %v227_v4  ;;  %v1242_v17 = vld [vmem:[%s2170_s2] ss:$0 sm:$0xff]  ;;  %v245_v19 = vand.u32 4294901760, %v1567_v15  ;;  %v248_v20 = vand.u32 4294901760, %v1572_v16  ;;  %v1607_v22 = vld [vmem:[%s2169_s1 + $0x48] sm:$0xff]  ;;  %v1625_v27 = vld [vmem:[%s2169_s1 + $0x50] sm:$0xff]  ;;  %v1662_v38 = vsub.f32 %v1515_v0, %v227_v4 }
  0x11   : > { %v1558_v12 = vpack.c.bf16 %v236_v8, %v233_v7  ;;  %s2246_s20 = smov (!%p165_p3, %s1225_s20), 7  ;;  %v1586_v18 = vpack.c.bf16 %v242_v14, %v239_v13  ;;  %v1602_v21 = vld [vmem:[%s2169_s1 + $0x40] sm:$0xff]  ;;  %1082 = vrot.lane.b32.xlu0 %v1242_v17, %s1482_s15  ;;  %v254_v26 = vand.u32 4294901760, %v1607_v22  ;;  %v1630_v28 = vld [vmem:[%s2169_s1 + $0x58] sm:$0xff]  ;;  %vm209_vm0 = vcmask 228352   ;;  %v1658_v36 = vld [vmem:[%s2169_s1 + $0x68] sm:$0xff] }
  0x12   : > { %1248 = vmatpush1.bf16.msra.mxu1 %v1550_v11  ;;  %1338 = vmatpush1.bf16.msra.mxu0 %v1550_v11  ;;  %s1245_s4 = sshll.u32 %s2246_s20, 3  ;;  %v1616_v24 = vpack.c.bf16 %v248_v20, %v245_v19  ;;  %v251_v25 = vand.u32 4294901760, %v1602_v21  ;;  %v257_v32 = vand.u32 4294901760, %v1625_v27  ;;  %v260_v33 = vand.u32 4294901760, %v1630_v28  ;;  %v1653_v35 = vld [vmem:[%s2169_s1 + $0x60] sm:$0xff]  ;;  %v1685_v44 = vld [vmem:[%s2169_s1 + $0x70] sm:$0xff] }
  0x13   : > { %1249 = vmatprep.subr.bf16.mxu1 %v2182_v3  ;;  %1339 = vmatprep.subr.bf16.mxu0 %v2182_v3  ;;  %s1595_s9 = scalar_lea.vmem %s2168_s0, %s1245_s4  ;;  %v263_v40 = vand.u32 4294901760, %v1653_v35  ;;  %v2181_v41 = vand.u32 4294901760, %v1658_v36  ;;  %v1678_v43 = vsub.f32 %v1520_v1, %v230_v5  ;;  %v1690_v45 = vld [vmem:[%s2169_s1 + $0x78] sm:$0xff]  ;;  %v1697_v48 = vsub.f32 %v1525_v2, %v233_v7  ;;  %v1712_v52 = vld [vmem:[%s2169_s1 + $0x80] sm:$0xff]  ;;  %v1717_v53 = vld [vmem:[%s2169_s1 + $0x88] sm:$0xff]  ;;  %s175_s15 = scalar_lea.vmem %s2171_s3, %s1245_s4 }
  0x14   : > { %v177_v23 = vld [vmem:[%s1595_s9] sm:$0xff]  ;;  %v1642_v31 = vpack.c.bf16 %v254_v26, %v251_v25  ;;  %v1670_v39 = vpack.c.bf16 %v260_v33, %v257_v32  ;;  %v2177_v50 = vand.u32 4294901760, %v1685_v44  ;;  %v2174_v51 = vand.u32 4294901760, %v1690_v45  ;;  %v208_v55 = vld [vmem:[%s2169_s1 + $0x98] sm:$0xf]  ;;  %v178_v61 = vld [vmem:[%s1595_s9 + $0x8] sm:$0xff] }
  0x15   : > { %v1632_v29 = vunpack.c.h.bf16 %v177_v23  ;;  %v1692_v46 = vunpack.c.l.bf16 %v177_v23  ;;  %v1705_v49 = vpack.c.bf16 %v2181_v41, %v263_v40  ;;  %v370_v54 = vand.u32 4294901760, %v1662_v38  ;;  %v1761_v2 = vld [vmem:[%s2169_s1 + $0x90] sm:$0xff] }
  0x16   : > { %1251 = vmatpush1.bf16.msra.mxu1 %v1558_v12  ;;  %1341 = vmatpush1.bf16.msra.mxu0 %v1558_v12  ;;  %2199 = vst [vmem:[#allocation2_spill] sm:$0xff] %v1642_v31  ;;  %2201 = vst [vmem:[#allocation4_spill] sm:$0xff] %v1670_v39  ;;  %vm222_vm1 = vcmask 1043456   ;;  %v377_v57 = vand.u32 4294901760, %v1678_v43  ;;  %v1733_v58 = vsub.f32 %v1534_v6, %v236_v8  ;;  %v1738_v59 = vsub.f32 %v1541_v9, %v239_v13  ;;  %v179_v4 = vld [vmem:[%s1595_s9 + $0x10] sm:$0xff] }
  0x17   : > { %1252 = vmatprep.subr.bf16.mxu1 %v2182_v3  ;;  %1342 = vmatprep.subr.bf16.mxu0 %v2182_v3  ;;  %v211_v30 = vsel %vm209_vm0, %v1632_v29, 0  ;;  %2202 = vst [vmem:[#allocation5_spill] sm:$0xff] %v1705_v49  ;;  %v1727_v56 = vsub.f32 %v1692_v46, %v1692_v46  ;;  %v1743_v60 = vsub.f32 %v1546_v10, %v242_v14  ;;  %v2173_v0 = vand.u32 4294901760, %v1712_v52 }
  0x18   : > { %v1646_v34 = vsub.f32 %v211_v30, %v211_v30  ;;  %v1749_v62 = vsub.f32 %v1567_v15, %v245_v19  ;;  %v1754_v63 = vsub.f32 %v1572_v16, %v248_v20  ;;  %v2172_v1 = vand.u32 4294901760, %v1717_v53 }
  0x19   : > { %2203 = vst [vmem:[#allocation6_spill] sm:$0xff] %v1727_v56  ;;  %v1770_v5 = vpack.c.bf16 %v2174_v51, %v2177_v50  ;;  %v1773_v6 = vsel %vm222_vm1, %v208_v55, 0  ;;  %v371_v7 = vsub.f32 %v1662_v38, %v370_v54  ;;  %v2179_v8 = vand.u32 4294901760, %v1697_v48 }
  0x1a   : > { %1254 = vmatpush1.bf16.msra.mxu1 %v1586_v18  ;;  %1344 = vmatpush1.bf16.msra.mxu0 %v1586_v18  ;;  %2200 = vst [vmem:[#allocation3_spill] sm:$0xff] %v1646_v34  ;;  %v312_v37 = vand.u32 4294901760, %v1646_v34  ;;  %v2180_v9 = vand.u32 4294901760, %v1727_v56  ;;  %v378_v10 = vsub.f32 %v1678_v43, %v377_v57  ;;  %v1785_v13 = vunpack.c.h.bf16 %v178_v61 }
  0x1b   : > { %1255 = vmatprep.subr.bf16.mxu1 %v2182_v3  ;;  %1345 = vmatprep.subr.bf16.mxu0 %v2182_v3  ;;  %2204 = vst [vmem:[#allocation7_spill] sm:$0xff] %v1770_v5  ;;  %v1787_v14 = vunpack.c.l.bf16 %v178_v61  ;;  %v1792_v15 = vsub.f32 %v1602_v21, %v251_v25  ;;  %v1797_v16 = vsub.f32 %v1607_v22, %v254_v26  ;;  %v2176_v17 = vand.u32 4294901760, %v1761_v2 }
  0x1c   : > { %v313_v42 = vsub.f32 %v1646_v34, %v312_v37  ;;  %780 = vmatprep.mubr.f32.mxu0 %v312_v37  ;;  %v1800_v19 = vunpack.c.h.bf16 %v179_v4  ;;  %v2175_v20 = vand.u32 4294901760, %v1773_v6  ;;  %v214_v23 = vsel %vm209_vm0, %v1785_v13, 0 }
  0x1d   : > { %v1807_v30 = vsub.f32 %v1787_v14, %v1787_v14  ;;  %v1809_v21 = vunpack.c.l.bf16 %v179_v4  ;;  %v1817_v22 = vpack.c.bf16 %v2172_v1, %v2173_v0  ;;  %v2178_v25 = vand.u32 4294901760, %v1733_v58  ;;  %v180_v4 = vld [vmem:[%s1595_s9 + $0x18] sm:$0xff]  ;;  %s1483_s9 = smov 124  }
  0x1e   : > { %1257 = vmatpush1.bf16.msra.mxu1 %v1616_v24  ;;  %1347 = vmatpush1.bf16.msra.mxu0 %v1616_v24  ;;  %v314_v47 = vand.u32 4294901760, %v313_v42  ;;  %v1820_v26 = vsub.f32 %v214_v23, %v214_v23  ;;  %v217_v37 = vsel %vm209_vm0, %v1800_v19, 0  ;;  %v318_v42 = vsub.f32 %v1727_v56, %v2180_v9 }
  0x1f   : > { %1258 = vmatprep.subr.bf16.mxu1 %v2182_v3  ;;  %1348 = vmatprep.subr.bf16.mxu0 %v2182_v3  ;;  %2205 = vst [vmem:[#allocation8_spill] sm:$0xff] %v1817_v22  ;;  %v379_v55 = vand.u32 4294901760, %v378_v10  ;;  %v385_v61 = vsub.f32 %v1697_v48, %v2179_v8  ;;  %v1836_v23 = vsub.f32 %v1625_v27, %v257_v32  ;;  %v2184_v32 = vand.u32 4294901760, %v1807_v30 }
  0x20   : > { %315 = vmatprep.mubr.f32.mxu1 %v314_v47  ;;  %2206 = vst [vmem:[#allocation9_spill] sm:$0xff] %v1820_v26  ;;  %v372_v47 = vand.u32 4294901760, %v371_v7  ;;  %v1841_v1 = vsub.f32 %v1630_v28, %v260_v33  ;;  %v326_v0 = vand.u32 4294901760, %v1820_v26  ;;  %v1844_v51 = vsub.f32 %v217_v37, %v217_v37 }
  0x21   : > { %v1849_v7 = vsub.f32 %v1653_v35, %v263_v40  ;;  %v1855_v27 = vpack.c.bf16 %v2175_v20, %v2176_v17  ;;  %v1860_v28 = vsub.f32 %v1809_v21, %v1809_v21  ;;  %v392_v33 = vsub.f32 %v1733_v58, %v2178_v25 }
  0x22   : > { %1260 = vmatpush1.bf16.msra.mxu1 %v1642_v31  ;;  %1350 = vmatpush1.bf16.msra.mxu0 %v1642_v31  ;;  %v2186_v35 = vand.u32 4294901760, %v1738_v59  ;;  %v2187_v40 = vand.u32 4294901760, %v1743_v60  ;;  %v1869_v10 = vunpack.c.h.bf16 %v180_v4  ;;  %v319_v37 = vand.u32 4294901760, %v318_v42 }
  0x23   : > { %1261 = vmatprep.subr.bf16.mxu1 %v2182_v3  ;;  %1351 = vmatprep.subr.bf16.mxu0 %v2182_v3  ;;  %2207 = vst [vmem:[#allocation10_spill] sm:$0xff] %v1855_v27  ;;  %v1277_v20 = vpack.c.bf16 %v379_v55, %v372_v47  ;;  %v1367_v17 = vpack.c.bf16 %v377_v57, %v370_v54  ;;  %v386_v50 = vand.u32 4294901760, %v385_v61  ;;  %v412_v25 = vand.u32 4294901760, %v1749_v62 }
  0x24   : > { %v419_v8 = vand.u32 4294901760, %v1754_v63  ;;  %v327_v9 = vsub.f32 %v1820_v26, %v326_v0  ;;  %v220_v47 = vsel %vm209_vm0, %v1869_v10, 0  ;;  %v1887_v55 = vunpack.c.l.bf16 %v180_v4 }
  0x25   : > { %v393_v54 = vand.u32 4294901760, %v392_v33  ;;  %v399_v57 = vsub.f32 %v1738_v59, %v2186_v35  ;;  %v406_v61 = vsub.f32 %v1743_v60, %v2187_v40  ;;  %v2209_v42 = vand.u32 4294901760, %v1658_v36 }
  0x26   : > { %1263 = vmatpush1.bf16.msra.mxu1 %v1670_v39  ;;  %1353 = vmatpush1.bf16.msra.mxu0 %v1670_v39  ;;  %v2210_v41 = vmov 0.0|0.0   ;;  %v1910_v35 = vsub.f32 %v1887_v55, %v1887_v55  ;;  %v328_v40 = vand.u32 4294901760, %v327_v9  ;;  %v420_v33 = vsub.f32 %v1754_v63, %v419_v8 }
  0x27   : > { %1264 = vmatprep.subr.bf16.mxu1 %v2182_v3  ;;  %1354 = vmatprep.subr.bf16.mxu0 %v2182_v3  ;;  %v1902_v4 = vsub.f32 %v1658_v36, %v2209_v42  ;;  %v1280_v9 = vpack.c.bf16 %v393_v54, %v386_v50  ;;  %v2215_v42 = vand.u32 4294901760, %v1733_v58  ;;  %v400_v31 = vand.u32 4294901760, %v399_v57 }
  0x28   : > { %v359_v39 = vand.u32 4294901760, %v1910_v35  ;;  %v2217_v34 = vand.u32 4294901760, %v1690_v45  ;;  %v2218_v50 = vand.u32 4294901760, %v1792_v15  ;;  %vm1117_vm2 = vcmask 31744  }
  0x29   : > { %vm1154_vm3 = vcmask 261120   ;;  %vm1159_vm4 = vcmask 269312  }
  0x2a   : > { %1266 = vmatpush1.bf16.msra.mxu1 %v1705_v49  ;;  %1356 = vmatpush1.bf16.msra.mxu0 %v1705_v49 }
  0x2b   : > { %1267 = vmatprep.subr.bf16.mxu1 %v2182_v3  ;;  %1357 = vmatprep.subr.bf16.mxu0 %v2182_v3 }
  0x2e   : > { %1269 = vmatpush1.bf16.msra.mxu1 %v1770_v5  ;;  %1359 = vmatpush1.bf16.msra.mxu0 %v1770_v5  ;;  %v2213_v5 = vand.u32 4294901760, %v1860_v28 }
  0x2f   : > { %1270 = vmatprep.subr.bf16.mxu1 %v2182_v3  ;;  %1360 = vmatprep.subr.bf16.mxu0 %v2182_v3 }
  0x30   : > { %v346_v49 = vsub.f32 %v1860_v28, %v2213_v5  ;;  %v1936_v5 = vsub.f32 %v1690_v45, %v2217_v34 }
  0x32   : > { %1272 = vmatpush1.bf16.msra.mxu1 %v1817_v22  ;;  %1362 = vmatpush1.bf16.msra.mxu0 %v1817_v22  ;;  %v2212_v22 = vand.u32 4294901760, %v1727_v56  ;;  %v407_v56 = vand.u32 4294901760, %v406_v61 }
  0x33   : > { %1273 = vmatprep.subr.bf16.mxu1 %v2182_v3  ;;  %1363 = vmatprep.subr.bf16.mxu0 %v2182_v3  ;;  %v332_v3 = vsub.f32 %v1807_v30, %v2184_v32  ;;  %v1897_v32 = vsub.f32 %v220_v47, %v220_v47  ;;  %v413_v47 = vsub.f32 %v1749_v62, %v412_v25 }
  0x35   : > { %2208 = vst [vmem:[#allocation11_spill] sm:$0xff] %v1897_v32  ;;  %v333_v26 = vand.u32 4294901760, %v332_v3  ;;  %v2220_v34 = vand.u32 4294901760, %v1897_v32  ;;  %v414_v61 = vand.u32 4294901760, %v413_v47  ;;  %v447_v47 = vand.u32 4294901760, %v1841_v1 }
  0x36   : > { %1275 = vmatpush1.bf16.msra.mxu1 %v1855_v27  ;;  %1365 = vmatpush1.bf16.msra.mxu0 %v1855_v27  ;;  %v2211_v27 = vand.u32 4294901760, %v1844_v51 }
  0x37   : > { %1276 = vmatprep.subr.bf16.mxu1 %v2210_v41  ;;  %1366 = vmatprep.subr.bf16.mxu0 %v2210_v41  ;;  %v355_v45 = vsub.f32 %v1897_v32, %v2220_v34  ;;  %v461_v34 = vand.u32 4294901760, %v1902_v4 }
  0x38   : > { %v341_v36 = vsub.f32 %v1844_v51, %v2211_v27  ;;  %v2214_v27 = vand.u32 4294901760, %v1697_v48 }
  0x39   : > { %320 = vmatmul.mubr.f32.vlgmr.msra.gmra.mrb[0].mxu1 %v319_v37  ;;  %783 = vmatmul.mubr.f32.vlgmr.msra.gmra.mrb[0].mxu0 %v2212_v22  ;;  %v2216_v22 = vand.u32 4294901760, %v1685_v44 }
  0x3a   : > { %1278 = vmatpush1.bf16.msra.mxu1 %v1277_v20  ;;  %1368 = vmatpush1.bf16.msra.mxu0 %v1367_v17  ;;  %v1370_v37 = vpack.c.bf16 %v2215_v42, %v2214_v27  ;;  %v427_v17 = vsub.f32 %v1792_v15, %v2218_v50  ;;  %v2219_v20 = vand.u32 4294901760, %v1797_v16  ;;  %v342_v57 = vand.u32 4294901760, %v341_v36 }
  0x3b   : > { %v1931_v3 = vsub.f32 %v1685_v44, %v2216_v22  ;;  %1279 = vmatprep.subr.bf16.mxu1 %v2210_v41  ;;  %1369 = vmatprep.subr.bf16.mxu0 %v2210_v41  ;;  %v2196_v44 = vand.u32 4294901760, %v1836_v23  ;;  %v421_v42 = vand.u32 4294901760, %v420_v33  ;;  %v2221_v27 = vand.u32 4294901760, %v1807_v30 }
  0x3c   : > { %v434_v54 = vsub.f32 %v1797_v16, %v2219_v20  ;;  %329 = vmatprep.mubr.f32.mxu1 %v328_v40  ;;  %790 = vmatprep.mubr.f32.mxu0 %v326_v0  ;;  %v347_v22 = vand.u32 4294901760, %v346_v49  ;;  %v360_v50 = vsub.f32 %v1910_v35, %v359_v39  ;;  %v1283_v40 = vpack.c.bf16 %v407_v56, %v400_v31 }
  0x3d   : > { %334 = vmatmul.mubr.f32.gmra.mrb[2].mxu1 %v333_v26  ;;  %793 = vmatmul.mubr.f32.gmra.mrb[2].mxu0 %v2221_v27  ;;  %v2222_v0 = vand.u32 4294901760, %v1738_v59  ;;  %v2223_v36 = vand.u32 4294901760, %v1743_v60  ;;  %v1092_v26 = vmul.f32 %v1785_v13, %v1785_v13  ;;  %v1376_v49 = vpack.c.bf16 %v419_v8, %v412_v25 }
  0x3e   : > { %1281 = vmatpush1.bf16.msra.mxu1 %v1280_v9  ;;  %1371 = vmatpush1.bf16.msra.mxu0 %v1370_v37  ;;  %v428_v33 = vand.u32 4294901760, %v427_v17  ;;  %v2197_v9 = vand.u32 4294901760, %v1849_v7  ;;  %v1090_v31 = vmul.f32 %v1632_v29, %v1632_v29  ;;  %v435_v56 = vand.u32 4294901760, %v434_v54 }
  0x3f   : > { %v1373_v20 = vpack.c.bf16 %v2223_v36, %v2222_v0  ;;  %1282 = vmatprep.subr.bf16.mxu1 %v2210_v41  ;;  %1372 = vmatprep.subr.bf16.mxu0 %v2210_v41  ;;  %v441_v37 = vsub.f32 %v1836_v23, %v2196_v44  ;;  %v2224_v27 = vand.u32 4294901760, %v1844_v51  ;;  %v356_v0 = vand.u32 4294901760, %v355_v45 }
  0x40   : > { %343 = vmatprep.mubr.f32.mxu1 %v342_v57  ;;  %v1286_v36 = vpack.c.bf16 %v421_v42, %v414_v61  ;;  %v2225_v8 = vand.u32 4294901760, %v1860_v28  ;;  %v361_v25 = vand.u32 4294901760, %v360_v50  ;;  %v1091_v17 = vmul.f32 %v1787_v14, %v1787_v14 }
  0x41   : > { %800 = vmatprep.mubr.f32.mxu0 %v2224_v27  ;;  %348 = vmatmul.mubr.f32.gmra.mrb[4].mxu1 %v347_v22  ;;  %v1089_v54 = vmul.f32 %v1692_v46, %v1692_v46  ;;  %v448_v57 = vsub.f32 %v1841_v1, %v447_v47  ;;  %v1101_v44 = vsel %vm209_vm0, %v1092_v26, 0.0  ;;  %v1094_v45 = vmul.f32 %v1800_v19, %v1800_v19 }
  0x42   : > { %803 = vmatmul.mubr.f32.gmra.mrb[4].mxu0 %v2225_v8  ;;  %1284 = vmatpush1.bf16.msra.mxu1 %v1283_v40  ;;  %v1097_v61 = vsel %vm209_vm0, %v1090_v31, 0.0  ;;  %v2226_v42 = vand.u32 4294901760, %v1712_v52  ;;  %v2227_v50 = vand.u32 4294901760, %v1717_v53  ;;  %v2228_v40 = vand.u32 4294901760, %v1792_v15 }
  0x43   : > { %1374 = vmatpush1.bf16.msra.mxu0 %v1373_v20  ;;  %1285 = vmatprep.subr.bf16.mxu1 %v2210_v41  ;;  %v2229_v20 = vand.u32 4294901760, %v1797_v16  ;;  %v1289_v31 = vpack.c.bf16 %v435_v56, %v428_v33  ;;  %v462_v8 = vsub.f32 %v1902_v4, %v461_v34  ;;  %v1093_v33 = vmul.f32 %v1809_v21, %v1809_v21 }
  0x44   : > { %v1987_v22 = vsub.f32 %v1712_v52, %v2226_v42  ;;  %v1992_v27 = vsub.f32 %v1717_v53, %v2227_v50  ;;  %1375 = vmatprep.subr.bf16.mxu0 %v2210_v41  ;;  %v455_v52 = vsub.f32 %v1849_v7, %v2197_v9  ;;  %v468_v42 = vand.u32 4294901760, %v1931_v3  ;;  %357 = vmatprep.mubr.f32.mxu1 %v356_v0 }
  0x45   : > { %v1379_v26 = vpack.c.bf16 %v2229_v20, %v2228_v40  ;;  %v2230_v53 = vand.u32 4294901760, %v1897_v32  ;;  %v475_v50 = vand.u32 4294901760, %v1936_v5  ;;  %362 = vmatmul.mubr.f32.gmra.mrb[6].mxu1 %v361_v25  ;;  %v1102_v40 = vadd.f32 %v1101_v44, %v1091_v17 }
  0x46   : > { %v1098_v56 = vadd.f32 %v1097_v61, %v1089_v54  ;;  %1287 = vmatpush1.bf16.msra.mxu1 %v1286_v36  ;;  %v442_v20 = vand.u32 4294901760, %v441_v37  ;;  %v449_v9 = vand.u32 4294901760, %v448_v57  ;;  %v1105_v0 = vsel %vm209_vm0, %v1094_v45, 0.0  ;;  %1230 = vmatprep.mubr.msk.f32.mxu1 %vm209_vm0, %v1632_v29 }
  0x47   : > { %810 = vmatprep.mubr.f32.mxu0 %v2230_v53  ;;  %1377 = vmatpush1.bf16.msra.mxu0 %v1376_v49  ;;  %v1096_v53 = vmul.f32 %v1869_v10, %v1869_v10  ;;  %v2231_v32 = vand.u32 4294901760, %v1761_v2  ;;  %v2233_v49 = vand.u32 4294901760, %v1836_v23  ;;  %v456_v36 = vand.u32 4294901760, %v455_v52 }
  0x48   : > { %813 = vmatmul.mubr.f32.gmra.mrb[6].mxu0 %v359_v39  ;;  %1288 = vmatprep.subr.bf16.mxu1 %v2210_v41  ;;  %v2232_v39 = vand.u32 4294901760, %v1773_v6  ;;  %v469_v17 = vsub.f32 %v1931_v3, %v468_v42  ;;  %v1106_v54 = vadd.f32 %v1105_v0, %v1093_v33  ;;  %v482_v57 = vand.u32 4294901760, %v1987_v22 }
  0x49   : > { %v2018_v25 = vsub.f32 %v1761_v2, %v2231_v32  ;;  %1378 = vmatprep.subr.bf16.mxu0 %v2210_v41  ;;  %v1382_v37 = vpack.c.bf16 %v447_v47, %v2233_v49  ;;  %1234 = vmatprep.mubr.msk.f32.mxu0 %vm209_vm0, %v1632_v29  ;;  %v463_v2 = vand.u32 4294901760, %v462_v8  ;;  %v476_v32 = vsub.f32 %v1936_v5, %v475_v50 }
  0x4a   : > { %v2025_v44 = vsub.f32 %v1773_v6, %v2232_v39  ;;  %1103 = vadd.xlane.f32.xlu1 %v1102_v40  ;;  %v1095_v6 = vmul.f32 %v1887_v55, %v1887_v55  ;;  %1099 = vadd.xlane.f32.xlu0 %v1098_v56  ;;  %v1292_v47 = vpack.c.bf16 %v449_v9, %v442_v20  ;;  %v489_v45 = vand.u32 4294901760, %v1992_v27 }
  0x4b   : > { %1290 = vmatpush1.bf16.msra.mxu1 %v1289_v31  ;;  %1380 = vmatpush1.bf16.msra.mxu0 %v1379_v26  ;;  %v1109_v61 = vsel %vm209_vm0, %v1096_v53, 0.0  ;;  %v2234_v52 = vand.u32 4294901760, %v1849_v7  ;;  %v1295_v40 = vpack.c.bf16 %v463_v2, %v456_v36  ;;  %v470_v33 = vand.u32 4294901760, %v469_v17 }
  0x4c   : > { %1291 = vmatprep.subr.bf16.mxu1 %v2210_v41  ;;  %1381 = vmatprep.subr.bf16.mxu0 %v2210_v41  ;;  %v477_v0 = vand.u32 4294901760, %v476_v32  ;;  %v1110_v31 = vadd.f32 %v1109_v61, %v1095_v6  ;;  %v483_v9 = vsub.f32 %v1987_v22, %v482_v57  ;;  %v490_v26 = vsub.f32 %v1992_v27, %v489_v45 }
  0x4d   : > { %v1385_v8 = vpack.c.bf16 %v461_v34, %v2234_v52  ;;  %v496_v56 = vand.u32 4294901760, %v2018_v25  ;;  %v503_v20 = vand.u32 4294901760, %v2025_v44  ;;  %v1388_v53 = vpack.c.bf16 %v475_v50, %v468_v42 }
  0x4e   : > { %1107 = vadd.xlane.f32.xlu1 %v1106_v54  ;;  %v1298_v34 = vpack.c.bf16 %v477_v0, %v470_v33  ;;  %v484_v39 = vand.u32 4294901760, %v483_v9  ;;  %v491_v49 = vand.u32 4294901760, %v490_v26  ;;  %v1391_v2 = vpack.c.bf16 %v489_v45, %v482_v57 }
  0x4f   : > { %1293 = vmatpush1.bf16.msra.mxu1 %v1292_v47  ;;  %1383 = vmatpush1.bf16.msra.mxu0 %v1382_v37  ;;  %v497_v37 = vsub.f32 %v2018_v25, %v496_v56  ;;  %v504_v36 = vsub.f32 %v2025_v44, %v503_v20  ;;  %v1394_v50 = vpack.c.bf16 %v503_v20, %v496_v56 }
  0x50   : > { %1294 = vmatprep.subr.bf16.mxu1 %v2210_v41  ;;  %1384 = vmatprep.subr.bf16.mxu0 %v2210_v41  ;;  %v1301_v17 = vpack.c.bf16 %v491_v49, %v484_v39  ;;  %v1307_v6 = vpack.c.bf16 %v1678_v43, %v1662_v38  ;;  %v1310_v47 = vpack.c.bf16 %v1733_v58, %v1697_v48  ;;  %v2235_v38 = vld [vmem:[#allocation3_spill] sm:$0xff]  ;;  %v2236_v43 = vld [vmem:[#allocation2_spill] sm:$0xff] }
  0x51   : > { %v498_v32 = vand.u32 4294901760, %v497_v37  ;;  %v505_v54 = vand.u32 4294901760, %v504_v36  ;;  %v1322_v48 = vpack.c.bf16 %v1841_v1, %v1836_v23  ;;  %v1325_v58 = vpack.c.bf16 %v1902_v4, %v1849_v7  ;;  %v2243_v23 = vld [vmem:[#allocation9_spill] sm:$0xff] }
  0x52   : > { %1111 = vadd.xlane.f32.xlu1 %v1110_v31  ;;  %v1334_v1 = vpack.c.bf16 %v2025_v44, %v2018_v25 }
  0x53   : > { %1296 = vmatpush1.bf16.msra.mxu1 %v1295_v40  ;;  %1386 = vmatpush1.bf16.msra.mxu0 %v1385_v8  ;;  %v1304_v42 = vpack.c.bf16 %v505_v54, %v498_v32 }
  0x54   : > { %1297 = vmatprep.subr.bf16.mxu1 %v2210_v41  ;;  %1387 = vmatprep.subr.bf16.mxu0 %v2210_v41 }
  0x57   : > { %1299 = vmatpush1.bf16.msra.mxu1 %v1298_v34  ;;  %1389 = vmatpush1.bf16.msra.mxu0 %v1388_v53 }
  0x58   : > { %1300 = vmatprep.subr.bf16.mxu1 %v2210_v41  ;;  %1390 = vmatprep.subr.bf16.mxu0 %v2210_v41 }
  0x5b   : > { %1302 = vmatpush1.bf16.msra.mxu1 %v1301_v17  ;;  %1392 = vmatpush1.bf16.msra.mxu0 %v1391_v2 }
  0x5c   : > { %1303 = vmatprep.subr.bf16.mxu1 %v2210_v41  ;;  %1393 = vmatprep.subr.bf16.mxu0 %v2210_v41 }
  0x5f   : > { %1305 = vmatpush1.bf16.msra.mxu1 %v1304_v42  ;;  %1395 = vmatpush1.bf16.msra.mxu0 %v1394_v50 }
  0x60   : > { %1306 = vmatprep.subr.bf16.mxu1 %v2210_v41  ;;  %1396 = vmatprep.subr.bf16.mxu0 %v2210_v41 }
  0x62   : > { %533 = vmatmul.mubr.f32.vlgmr.msra.gmra.mrb[0].mxu1 %v1692_v46  ;;  %944 = vmatmul.mubr.f32.vlgmr.msra.gmra.mrb[0].mxu0 %v1692_v46 }
  0x63   : > { %1308 = vmatpush1.bf16.msra.mxu1 %v1307_v6  ;;  %1398 = vmatpush1.bf16.msra.mxu0 %v1550_v11  ;;  %v1313_v11 = vpack.c.bf16 %v1743_v60, %v1738_v59  ;;  %v1328_v59 = vpack.c.bf16 %v1936_v5, %v1931_v3  ;;  %v2239_v60 = vld [vmem:[#allocation7_spill] sm:$0xff] }
  0x64   : > { %1309 = vmatprep.subr.bf16.mxu1 %v2210_v41  ;;  %1399 = vmatprep.subr.bf16.mxu0 %v2210_v41 }
  0x65   : > { %1231 = vmatprep.mubr.msk.f32.mxu1 %vm209_vm0, %v1785_v13  ;;  %1235 = vmatprep.mubr.msk.f32.mxu0 %vm209_vm0, %v1785_v13 }
  0x66   : > { %539 = vmatmul.mubr.f32.gmra.mrb[2].mxu1 %v1787_v14  ;;  %950 = vmatmul.mubr.f32.gmra.mrb[2].mxu0 %v1787_v14 }
  0x67   : > { %1311 = vmatpush1.bf16.msra.mxu1 %v1310_v47  ;;  %1401 = vmatpush1.bf16.msra.mxu0 %v1558_v12  ;;  %v1316_v12 = vpack.c.bf16 %v1754_v63, %v1749_v62  ;;  %v1331_v62 = vpack.c.bf16 %v1992_v27, %v1987_v22  ;;  %v2240_v63 = vld [vmem:[#allocation8_spill] sm:$0xff] }
  0x68   : > { %1312 = vmatprep.subr.bf16.mxu1 %v2210_v41  ;;  %1402 = vmatprep.subr.bf16.mxu0 %v2210_v41 }
  0x69   : > { %1232 = vmatprep.mubr.msk.f32.mxu1 %vm209_vm0, %v1800_v19  ;;  %1236 = vmatprep.mubr.msk.f32.mxu0 %vm209_vm0, %v1800_v19 }
  0x6a   : > { %545 = vmatmul.mubr.f32.gmra.mrb[4].mxu1 %v1809_v21  ;;  %956 = vmatmul.mubr.f32.gmra.mrb[4].mxu0 %v1809_v21 }
  0x6b   : > { %1314 = vmatpush1.bf16.msra.mxu1 %v1313_v11  ;;  %1404 = vmatpush1.bf16.msra.mxu0 %v1586_v18  ;;  %v1319_v18 = vpack.c.bf16 %v1797_v16, %v1792_v15  ;;  %v2241_v15 = vld [vmem:[#allocation10_spill] sm:$0xff] }
  0x6c   : > { %1315 = vmatprep.subr.bf16.mxu1 %v2210_v41  ;;  %1405 = vmatprep.subr.bf16.mxu0 %v2210_v41  ;;  %v2242_v16 = vld [vmem:[#allocation6_spill] sm:$0xff] }
  0x6d   : > { %1233 = vmatprep.mubr.msk.f32.mxu1 %vm209_vm0, %v1869_v10  ;;  %1237 = vmatprep.mubr.msk.f32.mxu0 %vm209_vm0, %v1869_v10 }
  0x6e   : > { %551 = vmatmul.mubr.f32.gmra.mrb[6].mxu1 %v1887_v55  ;;  %962 = vmatmul.mubr.f32.gmra.mrb[6].mxu0 %v1887_v55 }
  0x6f   : > { %1317 = vmatpush1.bf16.msra.mxu1 %v1316_v12  ;;  %1407 = vmatpush1.bf16.msra.mxu0 %v1616_v24  ;;  %v2237_v24 = vld [vmem:[#allocation4_spill] sm:$0xff] }
  0x70   : > { %1318 = vmatprep.subr.bf16.mxu1 %v2210_v41  ;;  %1408 = vmatprep.subr.bf16.mxu0 %v2210_v41 }
  0x71   : > { %662 = vmatprep.mubr.f32.mxu1 %v2235_v38  ;;  %1238 = vmatprep.mubr.msk.f32.mxu0 %vm209_vm0, %v1632_v29  ;;  %v2238_v29 = vld [vmem:[#allocation5_spill] sm:$0xff] }
  0x73   : > { %1320 = vmatpush1.bf16.msra.mxu1 %v1319_v18  ;;  %1410 = vmatpush1.bf16.msra.mxu0 %v2236_v43 }
  0x74   : > { %1321 = vmatprep.subr.bf16.mxu1 %v2210_v41  ;;  %1411 = vmatprep.subr.bf16.mxu0 %v2210_v41 }
  0x77   : > { %1323 = vmatpush1.bf16.msra.mxu1 %v1322_v48  ;;  %1413 = vmatpush1.bf16.msra.mxu0 %v2237_v24 }
  0x78   : > { %1324 = vmatprep.subr.bf16.mxu1 %v2210_v41  ;;  %1414 = vmatprep.subr.bf16.mxu0 %v2210_v41 }
  0x7b   : > { %1326 = vmatpush1.bf16.msra.mxu1 %v1325_v58  ;;  %1416 = vmatpush1.bf16.msra.mxu0 %v2238_v29 }
  0x7c   : > { %1327 = vmatprep.subr.bf16.mxu1 %v2210_v41  ;;  %1417 = vmatprep.subr.bf16.mxu0 %v2210_v41 }
  0x7f   : > { %1329 = vmatpush1.bf16.msra.mxu1 %v1328_v59  ;;  %1419 = vmatpush1.bf16.msra.mxu0 %v2239_v60 }
  0x80   : > { %1330 = vmatprep.subr.bf16.mxu1 %v2210_v41  ;;  %1420 = vmatprep.subr.bf16.mxu0 %v2210_v41 }
  0x83   : > { %1332 = vmatpush1.bf16.msra.mxu1 %v1331_v62  ;;  %1422 = vmatpush1.bf16.msra.mxu0 %v2240_v63 }
  0x84   : > { %1333 = vmatprep.subr.bf16.mxu1 %v2210_v41  ;;  %1423 = vmatprep.subr.bf16.mxu0 %v2210_v41  ;;  %v2244_v41 = vld [vmem:[#allocation11_spill] sm:$0xff] }
  0x87   : > { %1335 = vmatpush1.bf16.msra.mxu1 %v1334_v1  ;;  %1425 = vmatpush1.bf16.msra.mxu0 %v2241_v15 }
  0x8a   : > { %664 = vmatmul.mubr.f32.vlgmr.msra.gmra.mrb[0].mxu1 %v2242_v16  ;;  %1053 = vmatmul.mubr.f32.vlgmr.msra.gmra.mrb[0].mxu0 %v1692_v46  ;;  %v1083_v46 = vpop.permute.xlu0 %1082 }
  0x8b   : > { %670 = vmatprep.mubr.f32.mxu1 %v2243_v23  ;;  %1239 = vmatprep.mubr.msk.f32.mxu0 %vm209_vm0, %v1785_v13 }
  0x8e   : > { %672 = vmatmul.mubr.f32.gmra.mrb[2].mxu1 %v1807_v30  ;;  %1059 = vmatmul.mubr.f32.gmra.mrb[2].mxu0 %v1787_v14 }
  0x8f   : > { %678 = vmatprep.mubr.f32.mxu1 %v1844_v51  ;;  %1240 = vmatprep.mubr.msk.f32.mxu0 %vm209_vm0, %v1800_v19 }
  0x92   : > { %680 = vmatmul.mubr.f32.gmra.mrb[4].mxu1 %v1860_v28  ;;  %1065 = vmatmul.mubr.f32.gmra.mrb[4].mxu0 %v1809_v21 }
  0x93   : > { %686 = vmatprep.mubr.f32.mxu1 %v2244_v41  ;;  %1241 = vmatprep.mubr.msk.f32.mxu0 %vm209_vm0, %v1869_v10 }
  0x96   : > { %688 = vmatmul.mubr.f32.gmra.mrb[6].mxu1 %v1910_v35  ;;  %1071 = vmatmul.mubr.f32.gmra.mrb[6].mxu0 %v1887_v55 }
  0xd7   : > { %v1104_v53 = vpop.xlane.xlu1 %1103  ;;  %v1100_v36 = vpop.xlane.xlu0 %1099 }
  0xdb   : > { %v1108_v39 = vpop.xlane.xlu1 %1107 }
  0xdf   : > { %v1112_v49 = vpop.xlane.xlu1 %1111 }
 0x15d   : > { %v665_v13 = vpop.f32.mrb[0].mxu1  ;;  %v1054_v14 = vpop.f32.mrb[0].mxu0 }
 0x15e   : > { %v1426_v51 = vadd.f32 %v1054_v14, %v665_v13  ;;  %v667_v30 = vpop.f32.mrb[1].mxu1  ;;  %v1056_v7 = vpop.f32.mrb[1].mxu0 }
 0x160   : > { %v1085_v19 = vadd.f32 %v1426_v51, %v1083_v46  ;;  %v1113_v40 = vmul.f32 %v1426_v51, %v1426_v51 }
 0x161   : > { %v673_v4 = vpop.f32.mrb[2].mxu1  ;;  %v1060_v28 = vpop.f32.mrb[2].mxu0 }
 0x162   : > { %v1427_v3 = vadd.f32 %v1060_v28, %v673_v4  ;;  %v1062_v21 = vpop.f32.mrb[3].mxu0  ;;  %1142 = vrot.lane.b32.xlu1 %v1085_v19, %s1483_s9  ;;  %v675_v5 = vpop.f32.mrb[3].mxu1  ;;  %v1118_v33 = vsel %vm1117_vm2, %v1113_v40, 0.0 }
 0x164   : > { %v1086_v10 = vadd.f32 %v1427_v3, %v1083_v46  ;;  %v1114_v0 = vmul.f32 %v1427_v3, %v1427_v3 }
 0x165   : > { %v681_v22 = vpop.f32.mrb[4].mxu1  ;;  %v1066_v35 = vpop.f32.mrb[4].mxu0 }
 0x166   : > { %v1428_v27 = vadd.f32 %v1066_v35, %v681_v22  ;;  %v1068_v55 = vpop.f32.mrb[5].mxu0  ;;  %1144 = vrot.lane.b32.xlu0 %v1086_v10, %s1483_s9  ;;  %v683_v25 = vpop.f32.mrb[5].mxu1  ;;  %v1121_v31 = vsel %vm1117_vm2, %v1114_v0, 0.0 }
 0x168   : > { %v1087_v9 = vadd.f32 %v1428_v27, %v1083_v46  ;;  %v1115_v26 = vmul.f32 %v1428_v27, %v1428_v27 }
 0x169   : > { %v689_v44 = vpop.f32.mrb[6].mxu1  ;;  %v1072_v57 = vpop.f32.mrb[6].mxu0 }
 0x16a   : > { %v1429_v45 = vadd.f32 %v1072_v57, %v689_v44  ;;  %v691_v61 = vpop.f32.mrb[7].mxu1  ;;  %v1074_v52 = vpop.f32.mrb[7].mxu0  ;;  %v1124_v56 = vsel %vm1117_vm2, %v1115_v26, 0.0 }
 0x16c   : > { %v1088_v8 = vadd.f32 %v1429_v45, %v1083_v46  ;;  %v1116_v20 = vmul.f32 %v1429_v45, %v1429_v45 }
 0x16e   : > { %v1127_v34 = vsel %vm1117_vm2, %v1116_v20, 0.0 }
 0x186   : > { %1119 = vadd.xlane.f32.xlu1 %v1118_v33 }
 0x18a   : > { %1122 = vadd.xlane.f32.xlu1 %v1121_v31 }
 0x19b   : > { %1146 = vrot.lane.b32.xlu1 %v1087_v9, %s1483_s9 }
 0x1bf   : > { %1125 = vadd.xlane.f32.xlu1 %v1124_v56 }
 0x1c3   : > { %1128 = vadd.xlane.f32.xlu1 %v1127_v34 }
 0x1d4   : > { %1148 = vrot.lane.b32.xlu1 %v1088_v8, %s1483_s9  ;;  %v1143_v37 = vpop.permute.xlu1 %1142 }
 0x1d8   : > { %v1145_v47 = vpop.permute.xlu0 %1144 }
 0x213   : > { %v1120_v17 = vpop.xlane.xlu1 %1119 }
 0x214   : > { %v1130_v2 = vsub.f32 %v1120_v17, %v1100_v36 }
 0x216   : > { %v1134_v32 = vmul.f32 0.5, %v1130_v2 }
 0x217   : > { %v1123_v54 = vpop.xlane.xlu1 %1122 }
 0x218   : > { %v1155_v42 = vsel %vm1154_vm3, %v1143_v37, %v1134_v32  ;;  %v1131_v50 = vsub.f32 %v1123_v54, %v1104_v53 }
 0x219   : > { %1160 = vst.msk [vmem:[%s175_s15] sm:$0xff] %vm1159_vm4, %v1155_v42 }
 0x21a   : > { %v1135_v6 = vmul.f32 0.5, %v1131_v50 }
 0x21b   : > { %v1147_v12 = vpop.permute.xlu1 %1146 }
 0x21c   : > { %v1156_v11 = vsel %vm1154_vm3, %v1145_v47, %v1135_v6 }
 0x21d   : > { %1161 = vst.msk [vmem:[%s175_s15 + $0x8] sm:$0xff] %vm1159_vm4, %v1156_v11 }
 0x24c   : > { %v1126_v18 = vpop.xlane.xlu1 %1125 }
 0x24d   : > { %v1132_v38 = vsub.f32 %v1126_v18, %v1108_v39 }
 0x24f   : > { %v1136_v43 = vmul.f32 0.5, %v1132_v38 }
 0x250   : > { %v1129_v48 = vpop.xlane.xlu1 %1128 }
 0x251   : > { %v1157_v24 = vsel %vm1154_vm3, %v1147_v12, %v1136_v43  ;;  %v1133_v58 = vsub.f32 %v1129_v48, %v1112_v49 }
 0x252   : > { %1162 = vst.msk [vmem:[%s175_s15 + $0x10] sm:$0xff] %vm1159_vm4, %v1157_v24 }
 0x253   : > { %v1137_v29 = vmul.f32 0.5, %v1133_v58 }
 0x254   : > { %v1149_v59 = vpop.permute.xlu1 %1148 }
 0x255   : > { %v1158_v60 = vsel %vm1154_vm3, %v1149_v59, %v1137_v29 }
 0x256   : > { %1163 = vst.msk [vmem:[%s175_s15 + $0x18] sm:$0xff] %vm1159_vm4, %v1158_v60 }
 0x257 PF: > { %s13_s12 = sadd.s32 1, %s1479_s12  }
 0x258   : > { %p10_p4 = scmp.ge.s32.totalorder %s13_s12, 4  }
 0x25a   :  { %12 = sbr.rel (!%p10_p4) target bundleno = 1 (0x1), region = 62 }

</bundles_post_ra>
